<compile_context>
chip_gen: v7x
topology: tpu7x:2x2x1
jax: 0.10.0
libtpu: 0.0.40
codegen_flags: <defaults>
</compile_context>

<pallas_src>
import numpy as np
import jax
import jax.numpy as jnp
from jax.experimental import pallas as pl
from jax.experimental.pallas import tpu as pltpu


_FOLD_LANE_CAP = 32768                 # max folded row width (lanes) when merging batch rows
_VMEM_OUT_BUDGET = 8 * 1024 * 1024     # target bytes for one (single-buffered) output block
_VMEM_LIMIT = 40 * 1024 * 1024         # scoped VMEM limit (fits v7x's 64 MiB physical VMEM)


def positional_encoding_1d(tensor: jax.Array) -> jax.Array:
    """Pallas equivalent of PositionalEncoding1D(channels=tensor.shape[-1])(tensor)."""
    if tensor.ndim != 3:
        raise RuntimeError("The input tensor has to be 3d!")
    batch, x, orig_ch = tensor.shape
    channels = int(np.ceil(orig_ch / 2) * 2)
    out_dtype = tensor.dtype
    itemsize = jnp.dtype(out_dtype).itemsize

    total_l = x * orig_ch  # flattened (x, ch) lane axis of one batch row

    # ---- fold identical batch rows into the lane axis so stores are lane-dense ----
    fold = 1
    if total_l % 128 != 0:
        kmax = max(1, min(batch, _FOLD_LANE_CAP // max(total_l, 1)))
        best = None
        for k in range(1, kmax + 1):
            if batch % k:
                continue
            L_k = k * total_l
            dense = (L_k % 128 == 0)
            # Prefer lane-dense folds; among dense prefer the smallest k (keeps
            # more sublane rows); among non-dense prefer the widest row.
            score = (1, -k) if dense else (0, L_k)
            if best is None or score > best[0]:
                best = (score, k)
        fold = best[1]
    rows_out = batch // fold
    L = fold * total_l

    # ---- block sizing (last dim %128 or full extent; sublane dim dtype-aligned) ----
    sub = max(1, 32 // itemsize)                       # 8 f32 / 16 bf16 / 32 int8
    lane_cap_bytes = _VMEM_OUT_BUDGET // max(1, min(rows_out, sub))
    lane_cap = max(128, ((lane_cap_bytes // itemsize) // 128) * 128)
    l_blk = L if L <= lane_cap else lane_cap           # full extent, or multiple of 128

    b_budget = max(1, _VMEM_OUT_BUDGET // (l_blk * itemsize))
    if b_budget >= rows_out:
        b_blk = rows_out                               # full extent
    else:
        b_blk = min(rows_out, max(sub, (b_budget // sub) * sub))

    n_l = pl.cdiv(L, l_blk)
    n_b = pl.cdiv(rows_out, b_blk)

    # ---- per-lane constant rows over the full folded lane axis (tiled by BlockSpec) ----
    flat = jnp.arange(L, dtype=jnp.int32) % total_l     # periodic across folded rows
    c = flat % orig_ch                                   # output channel of each lane
    xpos_row = (flat // orig_ch).astype(jnp.float32).reshape(1, L)
    inv_freq_half = 1.0 / (10000.0 ** (
        jnp.arange(0, channels, 2, dtype=jnp.float32) / channels))
    invf_row = jnp.take(inv_freq_half, c // 2).astype(jnp.float32).reshape(1, L)
    par_row = (c % 2).astype(jnp.float32).reshape(1, L)  # 0 -> sin slot, 1 -> cos slot

    def kernel(pos_ref, invf_ref, par_ref, o_ref):
        # One (1, l_blk) embedding row per step; the block fill (b_blk rows) and
        # the HBM writeback dominate, so the row compute is hidden under DMA.
        angle = pos_ref[...] * invf_ref[...]
        row = jnp.where(par_ref[...] != 0.0, jnp.cos(angle), jnp.sin(angle))
        o_ref[...] = jnp.broadcast_to(row.astype(o_ref.dtype), o_ref.shape)

    # Batch is the innermost grid axis -> the constant rows' block index is
    # unchanged across consecutive steps (re-DMA'd only when the lane tile moves).
    row_spec = pl.BlockSpec((1, l_blk), lambda l, b: (0, l))

    out2d = pl.pallas_call(
        kernel,
        out_shape=jax.ShapeDtypeStruct((rows_out, L), out_dtype),
        grid=(n_l, n_b),
        in_specs=[row_spec, row_spec, row_spec],
        out_specs=pl.BlockSpec((b_blk, l_blk), lambda l, b: (b, l)),
        compiler_params=pltpu.CompilerParams(
            dimension_semantics=("parallel", "parallel"),
            vmem_limit_bytes=_VMEM_LIMIT,
        ),
        cost_estimate=pl.CostEstimate(
            flops=2 * x * channels,
            transcendentals=2 * x * channels,
            bytes_accessed=rows_out * L * itemsize + 3 * L * 4,
        ),
    )(xpos_row, invf_row, par_row)

    # Free, layout-only reshape back to (batch, x, ch) (row-major data identical).
    return out2d.reshape(batch, x, orig_ch)


def _reference(tensor: jax.Array) -> jax.Array:
    """Pure-JAX reference mirroring the PyTorch forward."""
    batch, x, orig_ch = tensor.shape
    channels = int(np.ceil(orig_ch / 2) * 2)
    inv_freq = 1.0 / (10000.0 ** (jnp.arange(0, channels, 2, dtype=jnp.float32) / channels))
    pos_x = jnp.arange(x, dtype=jnp.float32)
    sin_inp = jnp.einsum("i,j->ij", pos_x, inv_freq)
    emb = jnp.stack([jnp.sin(sin_inp), jnp.cos(sin_inp)], axis=-1).reshape(x, channels)
    emb = emb.astype(tensor.dtype)
    return jnp.broadcast_to(emb[None, :, :orig_ch], (batch, x, orig_ch))


if __name__ == "__main__":
    key = jax.random.PRNGKey(0)
    batch, x, ch = 2, 16, 4
    tensor = jax.random.normal(key, (batch, x, ch), dtype=jnp.float32)

    out = jax.block_until_ready(positional_encoding_1d(tensor))
    ref = _reference(tensor)
    np.testing.assert_allclose(np.asarray(out), np.asarray(ref), rtol=1e-5, atol=1e-5)
    assert out.shape == tensor.shape and out.dtype == tensor.dtype

    # Odd-channel / non-lane-dense shape (exercises the channels-padding slice).
    t2 = jax.random.normal(jax.random.PRNGKey(1), (3, 10, 5), dtype=jnp.float32)
    out2 = jax.block_until_ready(positional_encoding_1d(t2))
    np.testing.assert_allclose(np.asarray(out2), np.asarray(_reference(t2)),
                               rtol=1e-5, atol=1e-5)

    print("KERNEL_OK")
</pallas_src>

<mosaic_0001>
module attributes {stable_mosaic.version = 11 : i64} {
  func.func @kernel(%arg0: i32, %arg1: i32, %arg2: memref<1x128xf32, #tpu.memory_space<vmem>>, %arg3: memref<1x128xf32, #tpu.memory_space<vmem>>, %arg4: memref<1x128xf32, #tpu.memory_space<vmem>>, %arg5: memref<1x128xf32, #tpu.memory_space<vmem>>) attributes {dimension_semantics = [#tpu.dimension_semantics<parallel>, #tpu.dimension_semantics<parallel>], iteration_bounds = array<i64: 1, 1>, scalar_prefetch = 0 : i64, scratch_operands = 0 : i64, tpu.core_type = #tpu.core_type<tc>, window_params = [{transform_indices = @transform_0, window_bounds = array<i64: 1, 128>}, {transform_indices = @transform_1, window_bounds = array<i64: 1, 128>}, {transform_indices = @transform_2, window_bounds = array<i64: 1, 128>}, {transform_indices = @transform_3, window_bounds = array<i64: 1, 128>}]} {
    %c0 = arith.constant 0 : index
    %c0_0 = arith.constant 0 : index
    %0 = vector.load %arg2[%c0, %c0_0] : memref<1x128xf32, #tpu.memory_space<vmem>>, vector<1x128xf32>
    %c0_1 = arith.constant 0 : index
    %c0_2 = arith.constant 0 : index
    %1 = vector.load %arg3[%c0_1, %c0_2] : memref<1x128xf32, #tpu.memory_space<vmem>>, vector<1x128xf32>
    %2 = arith.mulf %0, %1 : vector<1x128xf32>
    %c0_3 = arith.constant 0 : index
    %c0_4 = arith.constant 0 : index
    %3 = vector.load %arg4[%c0_3, %c0_4] : memref<1x128xf32, #tpu.memory_space<vmem>>, vector<1x128xf32>
    %cst = arith.constant 0.000000e+00 : f32
    %4 = vector.broadcast %cst : f32 to vector<1x128xf32>
    %5 = arith.cmpf one, %3, %4 : vector<1x128xf32>
    %6 = math.cos %2 : vector<1x128xf32>
    %7 = math.sin %2 : vector<1x128xf32>
    %8 = arith.select %5, %6, %7 : vector<1x128xi1>, vector<1x128xf32>
    %c0_5 = arith.constant 0 : index
    %c0_6 = arith.constant 0 : index
    %9 = vector.load %arg5[%c0_5, %c0_6] : memref<1x128xf32, #tpu.memory_space<vmem>>, vector<1x128xf32>
    tpu.vector_store %arg5[%c0_5, %c0_6], %8 {strides = array<i32>} : memref<1x128xf32, #tpu.memory_space<vmem>>, vector<1x128xf32>,
    return
  }
  func.func @transform_0(%arg0: i32, %arg1: i32) -> (i32, i32) {
    %c0_i32 = arith.constant 0 : i32
    %c0_i32_0 = arith.constant 0 : i32
    return %c0_i32, %arg0 : i32, i32
  }
  func.func @transform_1(%arg0: i32, %arg1: i32) -> (i32, i32) {
    %c0_i32 = arith.constant 0 : i32
    %c0_i32_0 = arith.constant 0 : i32
    return %c0_i32, %arg0 : i32, i32
  }
  func.func @transform_2(%arg0: i32, %arg1: i32) -> (i32, i32) {
    %c0_i32 = arith.constant 0 : i32
    %c0_i32_0 = arith.constant 0 : i32
    return %c0_i32, %arg0 : i32, i32
  }
  func.func @transform_3(%arg0: i32, %arg1: i32) -> (i32, i32) {
    %c0_i32 = arith.constant 0 : i32
    return %arg1, %arg0 : i32, i32
  }
}

</mosaic_0001>

<bundles_post_ra>
// kernel: tpu_custom_call.1
= control target key start
LH: loop header
LB: loop body
LE: loop exit
PB: predicated region body
PF: predicated region fallthrough
CT: control target
= control target key end

     0   :  { %8 = vsyncpa [#allocation3], 0  ;;  %s407_s0 = inlined_call_operand.hbm [shape: f32[1,128], index: 0, kind: input, shape index: {}]   ;;  %s408_s1 = inlined_call_operand.vmem [shape: f32[1,128], index: 1, kind: input, shape index: {}]   ;;  %s409_s2 = inlined_call_operand.vmem [shape: f32[1,128], index: 2, kind: input, shape index: {}]   ;;  %s410_s3 = inlined_call_operand.hbm [shape: f32[1,128], index: 3, kind: output, shape index: {}]  }
   0x1   :  { %9 = vsyncpa [#allocation4], 0  ;;  %s328_s12 = smov [#allocation2]   ;;  %s280_s16 = scalar_lea.hbm %s407_s0, 16 }
   0x2   :  { %s16_s13 = sshll.u32 %s328_s12, 4  ;;  %p281_p0 = scmp.ne.s32.totalorder %s407_s0, %s280_s16  ;;  %s17_s13 = int_to_ptr.vmem [resolvable:$true] %s16_s13 }
   0x3   :  { %p284_p1 = scmp.lt.u32.totalorder %s280_s16, %s407_s0 }
   0x5   :  { %p286_p2 = pnand %p284_p1, %p281_p0 }
   0x7   :  { %289 = shalt.err (!%p286_p2)
}
   0x8   :  { %s290_s21 = scalar_lea.vmem %s17_s13, 16  ;;  %s294_s22 = scalar_lea.vmem %s17_s13, 32 }
   0x9   :  { %p291_p3 = scmp.ne.s32.totalorder %s17_s13, %s290_s21  ;;  %p295_p4 = scmp.lt.s32.totalorder %s17_s13, %s17_s13 }
   0xa   :  { %p296_p5 = scmp.lt.s32.totalorder %s294_s22, %s290_s21 }
   0xc   :  { %p297_p6 = por %p296_p5, %p295_p4 }
   0xe   :  { %p298_p7 = pnand %p297_p6, %p291_p3 }
  0x10   :  { %301 = shalt.err (!%p298_p7)
}
  0x11   :  { %19 = dma.hbm_to_vmem [thread:$0]  %s407_s0, 16, %s17_s13, [#allocation3]  }
  0x12   :  { %324 = dma.done.wait [#allocation3], 16  }
  0x13   :  { %325 = vsyncadd [#allocation3], 4294967280  ;;  %v27_v0 = vld [vmem:[#allocation2] sm:$0x1]  ;;  %v329_v14 = vmov 683565275  }
  0x14   :  { %v28_v1 = vld [vmem:[%s408_s1] sm:$0x1]  ;;  %v330_v16 = vmov 2475754826   ;;  %v331_v18 = vmov 2131351028  }
  0x15   :  { %v371_v2 = vmul.f32 %v28_v1, %v27_v0  ;;  %v332_v20 = vmov 2102212464   ;;  %v333_v22 = vmov 920167782   ;;  %v334_v29 = vmov 1326507024  }
  0x16   :  { %s335_s27 = smov [#allocation5]  }
  0x17   :  { %v35_v3 = vand.u32 2139095040, %v371_v2  ;;  %v32_v5 = vand.u32 2147483647, %v371_v2  ;;  %vm34_vm7 = vcmp.lt.s32.totalorder %v371_v2, 0  ;;  %vm124_vm15 = vweird.f32 %v371_v2  ;;  %s247_s28 = sshll.u32 %s335_s27, 4  ;;  %s248_s28 = int_to_ptr.vmem [resolvable:$true] %s247_s28 }
  0x18   :  { %s306_s29 = scalar_lea.vmem %s248_s28, 32  ;;  %p307_p9 = scmp.lt.s32.totalorder %s248_s28, %s248_s28 }
  0x19   :  { %v36_v4 = vshrl.u32 %v35_v3, 23  ;;  %v39_v8 = vand.u32 8388607, %v32_v5  ;;  %vm33_vm8 = vcmp.le.f32.partialorder %v32_v5, 0.7853982 }
  0x1b   :  { %v256_v6 = vadd.s32 4294967169, %v36_v4  ;;  %v40_v11 = vor.u32 8388608, %v39_v8 }
  0x1d   :  { %v42_v7 = vadd.s32 1, %v256_v6  ;;  %v80_v31 = vshll.u32 %v40_v11, 8 }
  0x1f   :  { %vm43_vm0 = vcmp.gt.s32.totalorder %v42_v7, 0 }
  0x20   :  { %v44_v9 = vsel %vm43_vm0, %v42_v7, 0 }
  0x21   :  { %v46_v10 = vand.u32 31, %v44_v9  ;;  %v45_v12 = vshrl.u32 %v44_v9, 5 }
  0x23   :  { %v47_v13 = vsub.s32 32, %v46_v10  ;;  %v49_v15 = vshll.u32 %v329_v14, %v46_v10  ;;  %v52_v17 = vshll.u32 %v330_v16, %v46_v10  ;;  %v55_v19 = vshll.u32 %v331_v18, %v46_v10 }
  0x24   :  { %v58_v21 = vshll.u32 %v332_v20, %v46_v10  ;;  %v61_v23 = vshll.u32 %v333_v22, %v46_v10  ;;  %vm64_vm1 = vcmp.lt.s32.totalorder %v45_v12, 1  ;;  %vm67_vm2 = vcmp.lt.s32.totalorder %v45_v12, 4 }
  0x25   :  { %v48_v24 = vshrl.u32 %v329_v14, %v47_v13  ;;  %v50_v25 = vshrl.u32 %v330_v16, %v47_v13  ;;  %v53_v26 = vshrl.u32 %v331_v18, %v47_v13  ;;  %v56_v27 = vshrl.u32 %v332_v20, %v47_v13 }
  0x26   :  { %v59_v28 = vshrl.u32 %v333_v22, %v47_v13  ;;  %v62_v30 = vshrl.u32 %v334_v29, %v47_v13  ;;  %vm65_vm3 = vcmp.lt.s32.totalorder %v45_v12, 2  ;;  %vm66_vm4 = vcmp.lt.s32.totalorder %v45_v12, 3 }
  0x27   :  { %v51_v32 = vor.u32 %v50_v25, %v49_v15  ;;  %v54_v33 = vor.u32 %v53_v26, %v52_v17  ;;  %v57_v34 = vor.u32 %v56_v27, %v55_v19  ;;  %v30_v27 = vld [vmem:[%s409_s2] sm:$0x1]  ;;  %s302_s2 = scalar_lea.vmem %s248_s28, 16 }
  0x28   :  { %v60_v35 = vor.u32 %v59_v28, %v58_v21  ;;  %v63_v36 = vor.u32 %v62_v30, %v61_v23  ;;  %vm31_vm0 = vcmp.ne.f32.partialorder %v30_v27, 0.0  ;;  %p303_p8 = scmp.ne.s32.totalorder %s248_s28, %s302_s2  ;;  %p308_p10 = scmp.lt.s32.totalorder %s306_s29, %s302_s2 }
  0x29   :  { %v68_v37 = vsel %vm64_vm1, %v48_v24, %v51_v32  ;;  %v69_v38 = vsel %vm67_vm2, %v57_v34, 2102212464  ;;  %v72_v39 = vsel %vm64_vm1, %v51_v32, %v54_v33  ;;  %v76_v40 = vsel %vm64_vm1, %v54_v33, %v57_v34 }
  0x2a   :  { %v70_v41 = vsel %vm66_vm4, %v54_v33, %v69_v38  ;;  %v73_v42 = vsel %vm67_vm2, %v60_v35, 920167782  ;;  %v77_v43 = vsel %vm67_vm2, %v63_v36, 1326507024  ;;  %p309_p11 = por %p308_p10, %p307_p9 }
  0x2b   :  { %v74_v44 = vsel %vm66_vm4, %v57_v34, %v73_v42  ;;  %v78_v45 = vsel %vm66_vm4, %v60_v35, %v77_v43  ;;  %v71_v46 = vsel %vm65_vm3, %v68_v37, %v70_v41 }
  0x2c   :  { %v75_v47 = vsel %vm65_vm3, %v72_v39, %v74_v44  ;;  %v79_v48 = vsel %vm65_vm3, %v76_v40, %v78_v45  ;;  %v87_v53 = vmul.u32 %v80_v31, %v71_v46  ;;  %p310_p12 = pnand %p309_p11, %p303_p8 }
  0x2d   :  { %v377_v49 = vmul.u32.u64.low %v80_v31, %v79_v48  ;;  %v378_v50 = vmul.u32.u64.high %v80_v31, %v79_v48, %v377_v49  ;;  %v380_v51 = vmul.u32.u64.low %v80_v31, %v75_v47  ;;  %v381_v52 = vmul.u32.u64.high %v80_v31, %v75_v47, %v380_v51 }
  0x2f   :  { %vm89_vm5 = vc.u32 %v378_v50, %v380_v51  ;;  %v90_v54 = vadd.s32 1, %v381_v52  ;;  %v88_v1 = vadd.s32 %v380_v51, %v378_v50 }
  0x31   :  { %v91_v55 = vsel %vm89_vm5, %v90_v54, %v381_v52 }
  0x32   :  { %v92_v56 = vadd.s32 %v91_v55, %v87_v53 }
  0x34   :  { %v93_v57 = vadd.s32 536870912, %v92_v56 }
  0x36   :  { %v94_v58 = vshrl.u32 %v93_v57, 30 }
  0x38   :  { %v95_v59 = vshll.u32 %v94_v58, 30  ;;  %v118_v15 = vsub.s32 4, %v94_v58 }
  0x3a   :  { %v96_v60 = vsub.s32 %v92_v56, %v95_v59  ;;  %v119_v18 = vsel %vm34_vm7, %v118_v15, %v94_v58 }
  0x3b   :  { %v121_v21 = vsel %vm33_vm8, 0, %v119_v18 }
  0x3c   :  { %v98_v61 = vsub.s32 0, %v96_v60  ;;  %v228_v22 = vadd.s32 3, %v121_v21  ;;  %v125_v23 = vand.u32 3, %v121_v21 }
  0x3e   :  { %v257_v62 = vmin.u32 %v98_v61, %v96_v60  ;;  %v229_v24 = vand.u32 3, %v228_v22  ;;  %vm130_vm9 = vcmp.eq.s32.totalorder %v125_v23, 2  ;;  %vm127_vm11 = vcmp.eq.s32.totalorder %v125_v23, 0 }
  0x3f   :  { %vm126_vm13 = vcmp.lt.s32.totalorder %v125_v23, 2 }
  0x40   :  { %v100_v63 = vclz %v257_v62  ;;  %vm234_vm10 = vcmp.eq.s32.totalorder %v229_v24, 2  ;;  %vm231_vm12 = vcmp.eq.s32.totalorder %v229_v24, 0  ;;  %vm230_vm14 = vcmp.lt.s32.totalorder %v229_v24, 2 }
  0x42   :  { %v258_v0 = vadd.s32 4294967294, %v100_v63 }
  0x44   :  { %vm259_vm6 = vcmp.lt.s32.totalorder %v258_v0, 0 }
  0x45   :  { %v103_v3 = vsel %vm259_vm6, 0, %v258_v0 }
  0x46   :  { %v104_v4 = vsub.s32 32, %v103_v3  ;;  %v105_v6 = vshll.u32 %v96_v60, %v103_v3  ;;  %v108_v7 = vsub.s32 4294967266, %v103_v3 }
  0x48   :  { %v106_v8 = vshrl.u32 %v88_v1, %v104_v4  ;;  %v109_v9 = vadd.s32 127, %v108_v7 }
  0x4a   :  { %v107_v10 = vor.u32 %v106_v8, %v105_v6  ;;  %v110_v11 = vshll.u32 %v109_v9, 23 }
  0x4c   :  { %v111_v12 = vor.u32 4788187, %v110_v11  ;;  %v114_v13 = vcvt.s32.f32 %v107_v10 }
  0x4e   :  { %v112_v14 = vand.u32 2147483647, %v111_v12 }
  0x50   :  { %v115_v16 = vmul.f32 %v114_v13, %v112_v14 }
  0x52   :  { %v116_v17 = vxor.u32 2147483648, %v115_v16 }
  0x54   :  { %v117_v19 = vsel %vm34_vm7, %v116_v17, %v115_v16 }
  0x55   :  { %v120_v20 = vsel %vm33_vm8, %v371_v2, %v117_v19 }
  0x56   :  { %276 = vcosq.f32 %v120_v20 }
  0x57   :  { %278 = vsinq.f32 %v120_v20 }
  0x60   :  { %v277_v25 = vpop.eup %276 }
  0x61   :  { %v279_v26 = vpop.eup %278  ;;  %v131_v5 = vxor.u32 2147483648, %v277_v25 }
  0x62   :  { %v128_v28 = vxor.u32 2147483648, %v279_v26 }
  0x63   :  { %v132_v29 = vsel %vm130_vm9, %v131_v5, %v279_v26  ;;  %v236_v30 = vsel %vm234_vm10, %v131_v5, %v279_v26 }
  0x64   :  { %v129_v31 = vsel %vm127_vm11, %v277_v25, %v128_v28  ;;  %v233_v32 = vsel %vm231_vm12, %v277_v25, %v128_v28 }
  0x65   :  { %v133_v33 = vsel %vm126_vm13, %v129_v31, %v132_v29  ;;  %v237_v34 = vsel %vm230_vm14, %v233_v32, %v236_v30 }
  0x66   :  { %v134_v35 = vsel %vm124_vm15, nan, %v133_v33  ;;  %v238_v36 = vsel %vm124_vm15, nan, %v237_v34 }
  0x67   :  { %v239_v37 = vsel %vm31_vm0, %v134_v35, %v238_v36 }
  0x68   :  { %240 = vst [vmem:[#allocation5] sm:$0x1] %v239_v37 }
  0x69   :  { %313 = shalt.err (!%p310_p12)
}
  0x6a   :  { %s314_s5 = scalar_lea.hbm %s410_s3, 16 }
  0x6b   :  { %p315_p13 = scmp.ne.s32.totalorder %s410_s3, %s314_s5  ;;  %p318_p0 = scmp.lt.u32.totalorder %s314_s5, %s410_s3 }
  0x6d   :  { %p320_p1 = pnand %p318_p0, %p315_p13 }
  0x6f   :  { %323 = shalt.err (!%p320_p1)
}
  0x70   :  { %250 = dma.vmem_to_hbm [thread:$0]  %s248_s28, 16, %s410_s3, [#allocation4]  }
  0x71   :  { %326 = dma.done.wait [#allocation4], 16  }
  0x72   :  { %327 = vsyncadd [#allocation4], 4294967280 }
  0x73   :  { %254 = vsyncpa [#allocation3], 1 }
  0x74   :  { %255 = vsyncpa [#allocation4], 1 }

</bundles_post_ra>
